<compile_context>
chip_gen: v7x
topology: tpu7x:2x2x1
jax: 0.10.0
libtpu: 0.0.40
codegen_flags: <defaults>
</compile_context>

<pallas_src>
import functools

import jax
import jax.numpy as jnp
from jax.experimental import pallas as pl
from jax.experimental.pallas import tpu as pltpu


def _round_up(x, m):
    return (x + m - 1) // m * m


def _vmem_capacity_bytes():
    """Physical VMEM per TensorCore; conservative fallback if query fails."""
    try:
        cap = getattr(pltpu.get_tpu_info(), "vmem_capacity_bytes", None)
        if cap:
            return int(cap)
    except Exception:
        pass
    return 64 * 1024 * 1024  # v7x per-TC size; safe lower bound everywhere


# ----------------------------------------------------------------------------
# Kernel 1: SPLADE max pooling over the sequence axis, tiled (batch, vocab).
# ----------------------------------------------------------------------------
def _splade_pool_kernel(logits_ref, mask_ref, out_ref, *, l_chunk):
    # logits_ref: (TN, L, TV), mask_ref: (TN, L, 1), out_ref: (TN, TV) f32
    tn, l, tv = logits_ref.shape
    n_full = l // l_chunk
    rem = l - n_full * l_chunk

    def chunk_raw_max(x, m):
        # Masked positions contribute exactly 0 (same as the reference's
        # multiply-by-mask after log1p(relu)); select, so garbage in the
        # not-taken branch never propagates.
        v = jnp.where(m > 0, x.astype(jnp.float32), 0.0)
        return jnp.max(v, axis=1)

    # Accumulate the running max directly in the VMEM output block so the
    # accumulator never has to stay live in vregs across the whole L loop.
    out_ref[...] = jnp.zeros_like(out_ref)

    if n_full <= 8:
        # Short fixed trip count: static slices, fully visible to the scheduler.
        for c in range(n_full):
            s = c * l_chunk
            out_ref[...] = jnp.maximum(
                out_ref[...],
                chunk_raw_max(logits_ref[:, s:s + l_chunk, :],
                              mask_ref[:, s:s + l_chunk, :]))
    else:
        def body(c, carry):
            s = pl.multiple_of(c * l_chunk, l_chunk)
            out_ref[...] = jnp.maximum(
                out_ref[...],
                chunk_raw_max(logits_ref[:, pl.ds(s, l_chunk), :],
                              mask_ref[:, pl.ds(s, l_chunk), :]))
            return carry
        jax.lax.fori_loop(0, n_full, body, 0)

    if rem:
        # Ragged tail of the sequence axis: static in-bounds slice, no OOB.
        s = n_full * l_chunk
        out_ref[...] = jnp.maximum(
            out_ref[...],
            chunk_raw_max(logits_ref[:, s:, :], mask_ref[:, s:, :]))

    # log1p(relu(.)) hoisted out of the sequence loop: exact because
    # log1p(relu) is monotone non-decreasing and masked positions are 0.
    out_ref[...] = jnp.log1p(jnp.maximum(out_ref[...], 0.0))


def _choose_pool_tiles(n, l, v, itemsize, per_buffer_budget):
    """Pick (batch_tile, vocab_tile) for the pool kernel.

    Vocab tile is a multiple of 128 up to 2048 lanes (mem-bound kernel: wide
    lane tiles amortize the ~0.35us/step grid overhead).  The batch tile is
    the full batch if it fits the per-(double-buffered)-logits-block budget,
    otherwise a multiple of 8 (partial last block handled by the cdiv grid
    plus masked writeback, so tn need not divide n).  tv is shrunk first if
    even the smallest batch tile would blow the budget.
    """
    v128 = _round_up(v, 128)
    tv = min(2048, v128)
    tn_min = n if n <= 8 else 8
    while tv > 128 and tn_min * l * tv * itemsize > per_buffer_budget:
        tv = max(128, _round_up(tv // 2, 128))

    if n <= 8:
        tn = n
    elif n * l * tv * itemsize <= per_buffer_budget:
        tn = n
    else:
        tn = 8
        while tn + 8 <= n and (tn + 8) * l * tv * itemsize <= per_buffer_budget:
            tn += 8
    return tn, tv


def splade_max_pool(logits, attention_mask):
    """max_over_seq(log1p(relu(logits)) * mask) with no pre-kernel padding.

    Works with f32 or bf16 logits (bf16 halves HBM traffic of this purely
    memory-bound kernel; compute is f32 inside the kernel either way).
    """
    n, l, v = logits.shape
    itemsize = jnp.dtype(logits.dtype).itemsize

    vmem_cap = _vmem_capacity_bytes()
    vmem_limit = int(min(96 * 1024 * 1024, (vmem_cap * 3) // 4))
    per_buffer_budget = min(16 * 1024 * 1024, vmem_limit // 3)
    tn, tv = _choose_pool_tiles(n, l, v, itemsize, per_buffer_budget)

    mask3 = attention_mask.astype(jnp.float32).reshape(n, l, 1)

    kernel = functools.partial(_splade_pool_kernel, l_chunk=8)
    pooled = pl.pallas_call(
        kernel,
        out_shape=jax.ShapeDtypeStruct((n, v), jnp.float32),
        grid_spec=pltpu.PrefetchScalarGridSpec(
            num_scalar_prefetch=0,
            grid=(pl.cdiv(n, tn), pl.cdiv(v, tv)),
            in_specs=[
                pl.BlockSpec((tn, l, tv), lambda i, j: (i, 0, j)),
                pl.BlockSpec((tn, l, 1), lambda i, j: (i, 0, 0)),
            ],
            out_specs=pl.BlockSpec((tn, tv), lambda i, j: (i, j)),
        ),
        compiler_params=pltpu.CompilerParams(
            dimension_semantics=("parallel", "parallel"),
            vmem_limit_bytes=vmem_limit,
        ),
    )(logits, mask3)
    return pooled


# ----------------------------------------------------------------------------
# Top-k sparsification (torch.topk + scatter back) — plain JAX glue.
# ----------------------------------------------------------------------------
def splade_topk(pooled, top_k):
    # TODO(synk): top-k is selection, not a dense hot path — plain JAX.
    kvals, kidx = jax.lax.top_k(pooled, top_k)
    n = pooled.shape[0]
    out = jnp.zeros_like(pooled)
    return out.at[jnp.arange(n)[:, None], kidx].set(kvals)


# ----------------------------------------------------------------------------
# Kernel 2: scores = q @ p.T with a parallel Bp axis and a tiled K reduction.
# ----------------------------------------------------------------------------
def _scores_kernel(q_ref, p_ref, out_ref):
    # q_ref: (Bq, TK), p_ref: (TBP, TK), out_ref: (Bq, TBP) f32 — resident
    # across the K axis (index_map ignores k), accumulated in place.
    @pl.when(pl.program_id(1) == 0)
    def _init():
        out_ref[...] = jnp.zeros_like(out_ref)

    # Contract dim 1 of both operands directly (no materialized transpose).
    out_ref[...] += jax.lax.dot_general(
        q_ref[...],
        p_ref[...],
        dimension_numbers=(((1,), (1,)), ((), ())),
        preferred_element_type=jnp.float32,
    )


def in_batch_scores(q_reps, p_reps, *, matmul_dtype=None):
    bq, v = q_reps.shape
    bp, v2 = p_reps.shape
    assert v == v2

    tk = min(2048, _round_up(v, 128))   # big contraction tile, fewer K steps
    v_pad = _round_up(v, tk)

    q, p = q_reps, p_reps
    if v_pad != v:
        # Reps are tiny relative to the logits tensor; zero-padding the
        # contraction dim keeps the K accumulation exact.
        q = jnp.pad(q, ((0, 0), (0, v_pad - v)))
        p = jnp.pad(p, ((0, 0), (0, v_pad - v)))
    if matmul_dtype is not None:
        # Optional bf16 MXU feed (2x less HBM, native 256x256 MXU path on
        # v6e/v7x); accumulation stays f32 via preferred_element_type.
        q = q.astype(matmul_dtype)
        p = p.astype(matmul_dtype)

    tbp = bp if bp <= 256 else 256            # lane-dense output tiles
    grid = (pl.cdiv(bp, tbp), v_pad // tk)    # (parallel Bp, arbitrary K)

    scores = pl.pallas_call(
        _scores_kernel,
        out_shape=jax.ShapeDtypeStruct((bq, bp), jnp.float32),
        grid_spec=pltpu.PrefetchScalarGridSpec(
            num_scalar_prefetch=0,
            grid=grid,
            in_specs=[
                pl.BlockSpec((bq, tk), lambda i, k: (0, k)),
                pl.BlockSpec((tbp, tk), lambda i, k: (i, k)),
            ],
            out_specs=pl.BlockSpec((bq, tbp), lambda i, k: (0, i)),
        ),
        compiler_params=pltpu.CompilerParams(
            dimension_semantics=("parallel", "arbitrary"),
            vmem_limit_bytes=32 * 1024 * 1024,
        ),
    )(q, p)
    return scores


def scores_and_ce(q_reps, p_reps, n_passages, *, matmul_dtype=None):
    bq = q_reps.shape[0]
    bp = p_reps.shape[0]
    # CE targets (i * n_passages) must be valid columns of the score matrix.
    assert (bq - 1) * n_passages < bp, "CE target column out of range"

    scores = in_batch_scores(q_reps, p_reps, matmul_dtype=matmul_dtype)

    # Cross-entropy over the (Bq, Bp) score matrix is O(Bq*Bp) — negligible;
    # keeping it in plain JAX leaves the kernel's Bp axis free to shard
    # across TensorCores on v7x.
    targets = jnp.arange(bq) * n_passages
    logp = jax.nn.log_softmax(scores, axis=1)
    loss = -jnp.mean(logp[jnp.arange(bq), targets])
    return scores, loss


# ----------------------------------------------------------------------------
# DenseModel.forward (training path) built from the kernels above.
# ----------------------------------------------------------------------------
def dense_model_forward(q_logits, q_mask, p_logits, p_mask, *, top_k, n_passages,
                        q_mlm_loss=jnp.float32(0.0), p_mlm_loss=jnp.float32(0.0),
                        matmul_dtype=None):
    q_reps = splade_topk(splade_max_pool(q_logits, q_mask), top_k)
    p_reps = splade_topk(splade_max_pool(p_logits, p_mask), top_k)
    scores, ce_loss = scores_and_ce(q_reps, p_reps, n_passages,
                                    matmul_dtype=matmul_dtype)
    loss = ce_loss + q_mlm_loss + p_mlm_loss
    return {"loss": loss, "scores": scores, "q_reps": q_reps, "p_reps": p_reps}


# ----------------------------------------------------------------------------
# Pure-JAX reference (mirrors the PyTorch forward) for a correctness check.
# ----------------------------------------------------------------------------
def _ref_forward(q_logits, q_mask, p_logits, p_mask, top_k, n_passages):
    def pool(logits, mask):
        x = jnp.max(jnp.log(1.0 + jax.nn.relu(logits))
                    * mask[..., None].astype(logits.dtype), axis=1)
        kv, ki = jax.lax.top_k(x, top_k)
        return jnp.zeros_like(x).at[jnp.arange(x.shape[0])[:, None], ki].set(kv)

    q = pool(q_logits, q_mask)
    p = pool(p_logits, p_mask)
    scores = q @ p.T
    targets = jnp.arange(q.shape[0]) * n_passages
    logp = jax.nn.log_softmax(scores, axis=1)
    loss = -jnp.mean(logp[jnp.arange(q.shape[0]), targets])
    return scores, loss


def _run_and_check(batch, n_passages, len_q, len_p, vocab, seed, *,
                   logits_dtype=jnp.float32, matmul_dtype=None,
                   atol=1e-5, rtol=1e-5):
    num_psg = batch * n_passages
    top_k = max(1, int(vocab * 0.01))

    key = jax.random.fold_in(jax.random.PRNGKey(0), seed)
    k1, k2 = jax.random.split(key)
    q_logits = jax.random.normal(k1, (batch, len_q, vocab), jnp.float32)
    p_logits = jax.random.normal(k2, (num_psg, len_p, vocab), jnp.float32)
    q_logits = q_logits.astype(logits_dtype)
    p_logits = p_logits.astype(logits_dtype)

    q_lens = (len_q - jnp.arange(batch) % 3).clip(1)
    p_lens = (len_p - jnp.arange(num_psg) % 5).clip(1)
    q_mask = (jnp.arange(len_q)[None, :] < q_lens[:, None]).astype(jnp.float32)
    p_mask = (jnp.arange(len_p)[None, :] < p_lens[:, None]).astype(jnp.float32)

    out = dense_model_forward(q_logits, q_mask, p_logits, p_mask,
                              top_k=top_k, n_passages=n_passages,
                              matmul_dtype=matmul_dtype)
    jax.block_until_ready(out["loss"])

    # Reference sees the same (possibly bf16-rounded) logits upcast to f32,
    # so the pooling path compares exactly; only matmul_dtype=bf16 deviates.
    ref_scores, ref_loss = _ref_forward(q_logits.astype(jnp.float32), q_mask,
                                        p_logits.astype(jnp.float32), p_mask,
                                        top_k, n_passages)
    assert jnp.allclose(out["scores"], ref_scores, atol=atol, rtol=rtol), "scores mismatch"
    assert jnp.allclose(out["loss"], ref_loss, atol=atol, rtol=rtol), "loss mismatch"


if __name__ == "__main__":
    # Small aligned config (batch=2 queries, 2 passages each, vocab=512).
    _run_and_check(batch=2, n_passages=2, len_q=8, len_p=16, vocab=512, seed=0)
    # Unaligned config exercising the in-kernel ragged L / V / Bp tile paths
    # (no pre-kernel padding of the logits tensor anymore).
    _run_and_check(batch=2, n_passages=2, len_q=7, len_p=10, vocab=320, seed=1)
    # bf16 logits feed (memory-bound pool kernel: half the HBM bytes);
    # reference applies the same cast, so results still match tightly.
    _run_and_check(batch=2, n_passages=2, len_q=8, len_p=16, vocab=512, seed=2,
                   logits_dtype=jnp.bfloat16)
    # bf16 MXU feed for the scoring matmul (f32 accumulation); loose tolerance.
    _run_and_check(batch=2, n_passages=2, len_q=8, len_p=16, vocab=512, seed=3,
                   logits_dtype=jnp.bfloat16, matmul_dtype=jnp.bfloat16,
                   atol=5e-2, rtol=5e-2)
    print("KERNEL_OK")
</pallas_src>

<mosaic_0001>
module attributes {stable_mosaic.version = 11 : i64} {
  func.func @_splade_pool_kernel(%arg0: i32, %arg1: i32, %arg2: memref<2x8x512xf32, #tpu.memory_space<vmem>>, %arg3: memref<2x8x1xf32, #tpu.memory_space<vmem>>, %arg4: memref<2x512xf32, #tpu.memory_space<vmem>>) attributes {dimension_semantics = [#tpu.dimension_semantics<parallel>, #tpu.dimension_semantics<parallel>], iteration_bounds = array<i64: 1, 1>, scalar_prefetch = 0 : i64, scratch_operands = 0 : i64, tpu.core_type = #tpu.core_type<tc>, window_params = [{transform_indices = @transform_0, window_bounds = array<i64: 2, 8, 512>}, {transform_indices = @transform_1, window_bounds = array<i64: 2, 8, 1>}, {transform_indices = @transform_2, window_bounds = array<i64: 2, 512>}]} {
    %cst = arith.constant 0.000000e+00 : f32
    %0 = vector.broadcast %cst : f32 to vector<2x512xf32>
    %c0 = arith.constant 0 : index
    %c0_0 = arith.constant 0 : index
    %1 = vector.load %arg4[%c0, %c0_0] : memref<2x512xf32, #tpu.memory_space<vmem>>, vector<2x512xf32>
    tpu.vector_store %arg4[%c0, %c0_0], %0 {strides = array<i32>} : memref<2x512xf32, #tpu.memory_space<vmem>>, vector<2x512xf32>,
    %c0_1 = arith.constant 0 : index
    %c0_2 = arith.constant 0 : index
    %2 = vector.load %arg4[%c0_1, %c0_2] : memref<2x512xf32, #tpu.memory_space<vmem>>, vector<2x512xf32>
    %c0_3 = arith.constant 0 : index
    %c0_4 = arith.constant 0 : index
    %c0_5 = arith.constant 0 : index
    %3 = vector.load %arg2[%c0_3, %c0_4, %c0_5] : memref<2x8x512xf32, #tpu.memory_space<vmem>>, vector<2x8x512xf32>
    %c0_6 = arith.constant 0 : index
    %c0_7 = arith.constant 0 : index
    %c0_8 = arith.constant 0 : index
    %4 = vector.load %arg3[%c0_6, %c0_7, %c0_8] : memref<2x8x1xf32, #tpu.memory_space<vmem>>, vector<2x8x1xf32>
    %cst_9 = arith.constant 0.000000e+00 : f32
    %5 = vector.broadcast %cst_9 : f32 to vector<2x8x1xf32>
    %6 = arith.cmpf ogt, %4, %5 : vector<2x8x1xf32>
    %cst_10 = arith.constant 0.000000e+00 : f32
    %7 = vector.shape_cast %6 : vector<2x8x1xi1> to vector<2x8x1xi1>
    %8 = vector.broadcast %7 : vector<2x8x1xi1> to vector<2x8x512xi1>
    %9 = vector.broadcast %cst_10 : f32 to vector<2x8x512xf32>
    %10 = arith.select %8, %3, %9 : vector<2x8x512xi1>, vector<2x8x512xf32>
    %cst_11 = arith.constant dense<0xFF800000> : vector<2x512xf32>
    %11 = vector.multi_reduction <maximumf>, %10, %cst_11 [1] : vector<2x8x512xf32> to vector<2x512xf32>
    %12 = arith.maximumf %2, %11 : vector<2x512xf32>
    %c0_12 = arith.constant 0 : index
    %c0_13 = arith.constant 0 : index
    %13 = vector.load %arg4[%c0_12, %c0_13] : memref<2x512xf32, #tpu.memory_space<vmem>>, vector<2x512xf32>
    tpu.vector_store %arg4[%c0_12, %c0_13], %12 {strides = array<i32>} : memref<2x512xf32, #tpu.memory_space<vmem>>, vector<2x512xf32>,
    %c0_14 = arith.constant 0 : index
    %c0_15 = arith.constant 0 : index
    %14 = vector.load %arg4[%c0_14, %c0_15] : memref<2x512xf32, #tpu.memory_space<vmem>>, vector<2x512xf32>
    %cst_16 = arith.constant 0.000000e+00 : f32
    %15 = vector.broadcast %cst_16 : f32 to vector<2x512xf32>
    %16 = arith.maximumf %14, %15 : vector<2x512xf32>
    %17 = math.log1p %16 : vector<2x512xf32>
    %c0_17 = arith.constant 0 : index
    %c0_18 = arith.constant 0 : index
    %18 = vector.load %arg4[%c0_17, %c0_18] : memref<2x512xf32, #tpu.memory_space<vmem>>, vector<2x512xf32>
    tpu.vector_store %arg4[%c0_17, %c0_18], %17 {strides = array<i32>} : memref<2x512xf32, #tpu.memory_space<vmem>>, vector<2x512xf32>,
    return
  }
  func.func @transform_0(%arg0: i32, %arg1: i32) -> (i32, i32, i32) {
    %c0_i32 = arith.constant 0 : i32
    %c0_i32_0 = arith.constant 0 : i32
    return %arg0, %c0_i32, %arg1 : i32, i32, i32
  }
  func.func @transform_1(%arg0: i32, %arg1: i32) -> (i32, i32, i32) {
    %c0_i32 = arith.constant 0 : i32
    %c0_i32_0 = arith.constant 0 : i32
    %c0_i32_1 = arith.constant 0 : i32
    return %arg0, %c0_i32, %c0_i32_0 : i32, i32, i32
  }
  func.func @transform_2(%arg0: i32, %arg1: i32) -> (i32, i32) {
    %c0_i32 = arith.constant 0 : i32
    return %arg0, %arg1 : i32, i32
  }
}

</mosaic_0001>

<bundles_post_ra>
// kernel: tpu_custom_call.1
= control target key start
LH: loop header
LB: loop body
LE: loop exit
PB: predicated region body
PF: predicated region fallthrough
CT: control target
= control target key end

     0   :  { %7 = vsyncpa [#allocation3], 0  ;;  %s300_s0 = inlined_call_operand.hbm [shape: f32[2,8,512], index: 0, kind: input, shape index: {}]   ;;  %s301_s1 = inlined_call_operand.vmem [shape: f32[2,8,1], index: 1, kind: input, shape index: {}]   ;;  %s302_s2 = inlined_call_operand.hbm [shape: f32[2,512], index: 2, kind: output, shape index: {}]  }
   0x1   :  { %8 = vsyncpa [#allocation4], 0  ;;  %s249_s9 = smov [#allocation2]   ;;  %s201_s13 = scalar_lea.hbm %s300_s0, 1024 }
   0x2   :  { %s14_s10 = sshll.u32 %s249_s9, 4  ;;  %p202_p0 = scmp.ne.s32.totalorder %s300_s0, %s201_s13  ;;  %s15_s10 = int_to_ptr.vmem [resolvable:$true] %s14_s10 }
   0x3   :  { %p205_p1 = scmp.lt.u32.totalorder %s201_s13, %s300_s0 }
   0x5   :  { %p207_p2 = pnand %p205_p1, %p202_p0 }
   0x7   :  { %210 = shalt.err (!%p207_p2)
}
   0x8   :  { %s211_s18 = scalar_lea.vmem %s15_s10, 1024  ;;  %p216_p4 = scmp.lt.s32.totalorder %s15_s10, %s15_s10 }
   0x9   :  { %p212_p3 = scmp.ne.s32.totalorder %s15_s10, %s211_s18  ;;  %p217_p5 = scmp.lt.s32.totalorder %s211_s18, %s211_s18 }
   0xb   :  { %p218_p6 = por %p217_p5, %p216_p4 }
   0xd   :  { %p219_p7 = pnand %p218_p6, %p212_p3 }
   0xf   :  { %222 = shalt.err (!%p219_p7)
}
  0x10   :  { %s250_s19 = smov 512   ;;  %s251_s20 = smov 32  }
  0x11   :  { %20 = dma.hbm_to_vmem [thread:$0]  %s300_s0, 1024, %s15_s10, [#allocation3], %s250_s19, %s250_s19, %s251_s20  }
  0x12   :  { %245 = dma.done.wait [#allocation3], 1024  }
  0x13   :  { %246 = vsyncadd [#allocation3], 4294966272  ;;  %v252_v0 = vmov 0   ;;  %v37_v1 = vld [vmem:[%s301_s1 + $0x8] sm:$0xff]  ;;  %v36_v2 = vld [vmem:[%s301_s1] sm:$0xff]  ;;  %v119_v7 = vlaneseq  ;;  %vm153_vm4 = vcmask 1041409  }
  0x14   :  { %198 = vset.pattern.permute.xlu0 %v252_v0  ;;  %vm39_vm0 = vcmp.gt.f32.partialorder %v37_v1, 0.0  ;;  %vm38_vm1 = vcmp.gt.f32.partialorder %v36_v2, 0.0  ;;  %v253_v5 = vmov 1983009808   ;;  %v32_v8 = vld [vmem:[#allocation2 + $0x20] sm:$0xff]  ;;  %v33_v9 = vld [vmem:[#allocation2 + $0x28] sm:$0xff] }
  0x15   :  { %v41_v3 = vsel %vm39_vm0, 1, %v252_v0  ;;  %v40_v4 = vsel %vm38_vm1, 1, %v252_v0  ;;  %v117_v6 = vunpack.c.l.s4 %v253_v5  ;;  %v34_v10 = vld [vmem:[#allocation2 + $0x30] sm:$0xff]  ;;  %v35_v11 = vld [vmem:[#allocation2 + $0x38] sm:$0xff]  ;;  %v120_v14 = vshrl.u32 %v119_v7, 7  ;;  %v28_v24 = vld [vmem:[#allocation2] sm:$0xff] }
  0x16   :  { %46 = vperm.xlu0 %198, %v41_v3   ;;  %v29_v29 = vld [vmem:[#allocation2 + $0x8] sm:$0xff]  ;;  %v30_v30 = vld [vmem:[#allocation2 + $0x10] sm:$0xff]  ;;  %v31_v31 = vld [vmem:[#allocation2 + $0x18] sm:$0xff]  ;;  %vm155_vm5 = vcmask 1043459   ;;  %vm157_vm6 = vcmask 1045509   ;;  %vm159_vm7 = vcmask 1047559  }
  0x17   :  { %v118_v13 = vunpack.c.0.s8 %v117_v6  ;;  %s254_s0 = smov [#allocation5]  }
  0x18   :  { %s182_s1 = sshll.u32 %s254_s0, 4  ;;  %s183_s1 = int_to_ptr.vmem [resolvable:$true] %s182_s1 }
  0x19   :  { %v121_v32 = vsub.s32 %v118_v13, %v120_v14  ;;  %s223_s27 = scalar_lea.vmem %s183_s1, 128  ;;  %p228_p9 = scmp.lt.s32.totalorder %s183_s1, %s183_s1 }
  0x1a   :  { %43 = vperm.xlu0 %198, %v40_v4   ;;  %p224_p8 = scmp.ne.s32.totalorder %s183_s1, %s223_s27  ;;  %p229_p10 = scmp.lt.s32.totalorder %s223_s27, %s223_s27 }
  0x1c   :  { %p230_p11 = por %p229_p10, %p228_p9 }
  0x1e   :  { %p231_p12 = pnand %p230_p11, %p224_p8 }
  0x95   :  { %v47_v12 = vpop.permute.xlu0 %46 }
  0x96   :  { %vm49_vm2 = vcmp.eq.s32.totalorder %v47_v12, 1 }
  0x97   :  { %v54_v15 = vsel %vm49_vm2, %v32_v8, 0.0  ;;  %v55_v16 = vsel %vm49_vm2, %v33_v9, 0.0  ;;  %v56_v17 = vsel %vm49_vm2, %v34_v10, 0.0  ;;  %v57_v18 = vsel %vm49_vm2, %v35_v11, 0.0 }
  0x98   :  { %v82_v19 = vrot.slane %v54_v15, 4  ;;  %v88_v20 = vrot.slane %v55_v16, 4  ;;  %v94_v21 = vrot.slane %v56_v17, 4  ;;  %v100_v22 = vrot.slane %v57_v18, 4 }
  0x99   :  { %v44_v23 = vpop.permute.xlu0 %43 }
  0x9a   :  { %v83_v25 = vmax.f32 %v54_v15, %v82_v19  ;;  %v89_v26 = vmax.f32 %v55_v16, %v88_v20  ;;  %v95_v27 = vmax.f32 %v56_v17, %v94_v21  ;;  %v101_v28 = vmax.f32 %v57_v18, %v100_v22 }
  0x9b   :  { %vm48_vm3 = vcmp.eq.s32.totalorder %v44_v23, 1 }
  0x9c   :  { %v84_v33 = vrot.slane %v83_v25, 2  ;;  %v90_v34 = vrot.slane %v89_v26, 2  ;;  %v96_v35 = vrot.slane %v95_v27, 2  ;;  %v102_v36 = vrot.slane %v101_v28, 2 }
  0x9d   :  { %v50_v37 = vsel %vm48_vm3, %v28_v24, 0.0  ;;  %v51_v38 = vsel %vm48_vm3, %v29_v29, 0.0  ;;  %v52_v39 = vsel %vm48_vm3, %v30_v30, 0.0  ;;  %v53_v40 = vsel %vm48_vm3, %v31_v31, 0.0 }
  0x9e   :  { %v85_v41 = vmax.f32 %v83_v25, %v84_v33  ;;  %v91_v42 = vmax.f32 %v89_v26, %v90_v34  ;;  %v97_v43 = vmax.f32 %v95_v27, %v96_v35  ;;  %v103_v44 = vmax.f32 %v101_v28, %v102_v36 }
  0x9f   :  { %v58_v45 = vrot.slane %v50_v37, 4  ;;  %v64_v46 = vrot.slane %v51_v38, 4  ;;  %v70_v47 = vrot.slane %v52_v39, 4  ;;  %v76_v48 = vrot.slane %v53_v40, 4 }
  0xa0   :  { %v86_v49 = vrot.slane %v85_v41, 1  ;;  %v92_v50 = vrot.slane %v91_v42, 1  ;;  %v98_v51 = vrot.slane %v97_v43, 1  ;;  %v104_v52 = vrot.slane %v103_v44, 1 }
  0xa1   :  { %v59_v53 = vmax.f32 %v50_v37, %v58_v45  ;;  %v65_v54 = vmax.f32 %v51_v38, %v64_v46  ;;  %v71_v55 = vmax.f32 %v52_v39, %v70_v47  ;;  %v77_v56 = vmax.f32 %v53_v40, %v76_v48 }
  0xa2   :  { %v87_v57 = vmax.f32 %v85_v41, %v86_v49  ;;  %v93_v58 = vmax.f32 %v91_v42, %v92_v50  ;;  %v99_v59 = vmax.f32 %v97_v43, %v98_v51  ;;  %v105_v60 = vmax.f32 %v103_v44, %v104_v52 }
  0xa3   :  { %v60_v61 = vrot.slane %v59_v53, 2  ;;  %v66_v62 = vrot.slane %v65_v54, 2  ;;  %v72_v63 = vrot.slane %v71_v55, 2  ;;  %v78_v0 = vrot.slane %v77_v56, 2 }
  0xa4   :  { %v131_v1 = vcombine.low %v87_v57, %v93_v58  ;;  %v132_v2 = vcombine.low %v99_v59, %v105_v60 }
  0xa5   :  { %v61_v3 = vmax.f32 %v59_v53, %v60_v61  ;;  %v67_v4 = vmax.f32 %v65_v54, %v66_v62  ;;  %v73_v5 = vmax.f32 %v71_v55, %v72_v63  ;;  %v79_v6 = vmax.f32 %v77_v56, %v78_v0 }
  0xa6   :  { %v139_v7 = vrot.slane %v131_v1, %v121_v32  ;;  %v146_v8 = vrot.slane %v132_v2, %v121_v32 }
  0xa7   :  { %v62_v9 = vrot.slane %v61_v3, 1  ;;  %v68_v10 = vrot.slane %v67_v4, 1  ;;  %v74_v11 = vrot.slane %v73_v5, 1  ;;  %v80_v12 = vrot.slane %v79_v6, 1 }
  0xa8   :  { %v147_v17 = vcombine.low %v139_v7, %v146_v8 }
  0xa9   :  { %v63_v13 = vmax.f32 %v61_v3, %v62_v9  ;;  %v69_v14 = vmax.f32 %v67_v4, %v68_v10  ;;  %v75_v15 = vmax.f32 %v73_v5, %v74_v11  ;;  %v81_v16 = vmax.f32 %v79_v6, %v80_v12 }
  0xaa   :  { %v152_v22 = vrot.slane %v147_v17, 7 }
  0xab   :  { %v114_v18 = vcombine.low %v63_v13, %v69_v14  ;;  %v115_v19 = vcombine.low %v75_v15, %v81_v16 }
  0xad   :  { %v122_v20 = vrot.slane %v114_v18, %v121_v32  ;;  %v129_v21 = vrot.slane %v115_v19, %v121_v32 }
  0xaf   :  { %v130_v23 = vcombine.low %v122_v20, %v129_v21 }
  0xb1   :  { %v154_v24 = vsel %vm153_vm4, %v152_v22, %v130_v23 }
  0xb2   :  { %v156_v25 = vsel %vm155_vm5, %v152_v22, %v154_v24 }
  0xb3   :  { %v158_v26 = vsel %vm157_vm6, %v152_v22, %v156_v25 }
  0xb4   :  { %v160_v27 = vsel %vm159_vm7, %v152_v22, %v158_v26 }
  0xb5   :  { %v162_v28 = vmax.f32 %v160_v27, 0.0 }
  0xb7   :  { %v165_v29 = vmax.f32 %v162_v28, 0.0 }
  0xb9   :  { %v166_v30 = vadd.f32 1.0, %v165_v29  ;;  %v169_v31 = vmul.f32 -0.5, %v165_v29  ;;  %v172_v34 = vand.u32 2147483647, %v165_v29 }
  0xbb   :  { %199 = vlog2.f32 %v166_v30  ;;  %v170_v33 = vadd.f32 1.0, %v169_v31  ;;  %vm173_vm8 = vcmp.lt.f32.partialorder %v172_v34, 0.0004427343 }
  0xbd   :  { %v171_v36 = vmul.f32 %v170_v33, %v165_v29 }
  0xc5   :  { %v200_v32 = vpop.eup %199 }
  0xc6   :  { %v168_v35 = vmul.f32 0.6931472, %v200_v32 }
  0xc8   :  { %v174_v37 = vsel %vm173_vm8, %v171_v36, %v168_v35 }
  0xc9   :  { %175 = vst [vmem:[#allocation5] sm:$0xff] %v174_v37 }
  0xca   :  { %234 = shalt.err (!%p231_p12)
}
  0xcb   :  { %s235_s30 = scalar_lea.hbm %s302_s2, 128 }
  0xcc   :  { %p236_p13 = scmp.ne.s32.totalorder %s302_s2, %s235_s30  ;;  %p239_p0 = scmp.lt.u32.totalorder %s235_s30, %s302_s2 }
  0xce   :  { %p241_p1 = pnand %p239_p0, %p236_p13 }
  0xd0   :  { %244 = shalt.err (!%p241_p1)
}
  0xd1   :  { %185 = dma.vmem_to_hbm [thread:$0]  %s183_s1, 128, %s302_s2, [#allocation4]  }
  0xd2   :  { %247 = dma.done.wait [#allocation4], 128  }
  0xd3   :  { %248 = vsyncadd [#allocation4], 4294967168 }
  0xd4   :  { %189 = vsyncpa [#allocation3], 1 }
  0xd5   :  { %190 = vsyncpa [#allocation4], 1 }

</bundles_post_ra>
